<compile_context>
chip_gen: v5e
topology: v5e:2x2
jax: 0.10.0
libtpu: 0.0.40
codegen_flags: <defaults>
</compile_context>

<pallas_src>
import functools
import math

import jax
import jax.numpy as jnp
from jax.experimental import pallas as pl
from jax.experimental.pallas import tpu as pltpu

_EPS = 1e-5
_LANE = 128
_SUBLANE = 8


def _round_up(x, m):
    return (x + m - 1) // m * m


def _mlp_layer_kernel(flags_ref, x_ref, w_ref, v_ref, o_ref, h_ref, *, n_real, d_in):
    """One grid step == one layer of the MLP.

    flags_ref : [L]          i32  SMEM (scalar prefetch)  1 -> Linear+BN+ReLU, 0 -> Linear
    x_ref     : [Npad, d_in] f32  VMEM (resident; constant block index)
    w_ref     : [Dpad, Dpad] bf16 VMEM (streamed per layer, double-buffered)
    v_ref     : [8, Dpad]    f32  VMEM (row 0: bias, 1: gamma, 2: beta; rest zero)
    o_ref     : [Npad, Dpad] f32  VMEM (resident output; written back at grid end)
    h_ref     : [Npad, Dpad] bf16 VMEM scratch (activation carried across layers)
    """
    l = pl.program_id(0)
    n_pad, d_pad = h_ref.shape
    needs_row_mask = n_pad != n_real
    if needs_row_mask:
        rows = jax.lax.broadcasted_iota(jnp.int32, (n_pad, d_pad), 0)
        row_mask = rows < n_real
    inv_n = jnp.float32(1.0 / n_real)

    # Layer 0: stage the input into the persistent bf16 activation scratch,
    # zero-padding the lane dimension here instead of materializing a padded
    # copy of x in HBM.
    @pl.when(l == 0)
    def _():
        if d_in == d_pad:
            h_ref[...] = x_ref[...].astype(h_ref.dtype)
        else:
            h_ref[...] = jnp.zeros_like(h_ref)
            h_ref[:, :d_in] = x_ref[...].astype(h_ref.dtype)

    # Linear: bf16 activation @ bf16 weight on the MXU, f32 accumulation.
    y = jnp.dot(h_ref[...], w_ref[...], preferred_element_type=jnp.float32)

    bias = v_ref[0:1, :]
    gamma = v_ref[1:2, :]
    beta = v_ref[2:3, :]
    has_bn = flags_ref[l] != 0

    def _store(r):
        h_ref[...] = r.astype(h_ref.dtype)   # bf16 carry for the next layer
        o_ref[...] = r                       # f32; only the last layer's write survives

    @pl.when(has_bn)
    def _():
        # Linear bias is exactly cancelled by the BN mean subtraction -> skipped.
        mean = jnp.sum(y, axis=0, keepdims=True) * inv_n
        diff = y - mean
        if needs_row_mask:
            diff = jnp.where(row_mask, diff, 0.0)
        var = jnp.sum(diff * diff, axis=0, keepdims=True) * inv_n  # biased, two-pass
        r = jnp.maximum(diff * jax.lax.rsqrt(var + _EPS) * gamma + beta, 0.0)
        if needs_row_mask:
            r = jnp.where(row_mask, r, 0.0)   # keep padded batch rows at zero
        _store(r)

    @pl.when(has_bn == False)  # noqa: E712  (traced scalar, not Python bool)
    def _():
        r = y + bias                          # plain Linear (+ bias)
        if needs_row_mask:
            r = jnp.where(row_mask, r, 0.0)
        _store(r)


def init_mlp_params(key, hidden_sizes):
    """nn.Linear default init (uniform +-1/sqrt(fan_in)); BN gamma=1, beta=0."""
    params = []
    for i in range(len(hidden_sizes) - 1):
        d_in, d_out = hidden_sizes[i], hidden_sizes[i + 1]
        key, kw, kb = jax.random.split(key, 3)
        bound = 1.0 / math.sqrt(d_in)
        w = jax.random.uniform(kw, (d_in, d_out), jnp.float32, -bound, bound)
        b = jax.random.uniform(kb, (d_out,), jnp.float32, -bound, bound)
        params.append({"w": w, "b": b,
                       "gamma": jnp.ones((d_out,), jnp.float32),
                       "beta": jnp.zeros((d_out,), jnp.float32)})
    return params


def pack_mlp_params(params, d_pad):
    """Stack per-layer params into lane-padded arrays (bf16 weights, f32 vectors)."""
    n_layers = len(params)
    w_stack = jnp.zeros((n_layers, d_pad, d_pad), jnp.bfloat16)
    v_stack = jnp.zeros((n_layers, 8, d_pad), jnp.float32)
    for i, p in enumerate(params):
        d_in, d_out = p["w"].shape
        w_stack = w_stack.at[i, :d_in, :d_out].set(p["w"].astype(jnp.bfloat16))
        v_stack = v_stack.at[i, 0, :d_out].set(p["b"])
        v_stack = v_stack.at[i, 1, :d_out].set(p["gamma"])
        v_stack = v_stack.at[i, 2, :d_out].set(p["beta"])
    return w_stack, v_stack


@functools.partial(jax.jit, static_argnames=("out_dim",))
def mlp_forward(x, w_stack, v_stack, bn_flags, *, out_dim):
    n, d_in = x.shape
    n_layers, d_pad, _ = w_stack.shape

    n_pad = _round_up(max(n, _SUBLANE), _SUBLANE)
    if n_pad != n:
        x = jnp.pad(x, ((0, n_pad - n), (0, 0)))     # <=7 rows; lanes padded in-kernel
    x = x.astype(jnp.float32)

    # Explicit VMEM budget: streamed weights are double-buffered, activation is one
    # persistent bf16 scratch. Floor at 32 MiB, cap well under v7x's 64 MiB physical.
    vmem_bytes = (2 * d_pad * d_pad * 2        # weights (double-buffered, bf16)
                  + 2 * 8 * d_pad * 4          # bias/gamma/beta (double-buffered)
                  + 2 * n_pad * d_in * 4       # input
                  + 2 * n_pad * d_pad * 4      # output
                  + n_pad * d_pad * 2)         # activation scratch (bf16)
    vmem_limit = int(min(max(2 * vmem_bytes + (4 << 20), 32 << 20), 56 << 20))

    flops = 2 * n_pad * d_pad * d_pad * n_layers
    bytes_accessed = (n_pad * d_in * 4 + w_stack.size * 2 + v_stack.size * 4
                      + n_pad * d_pad * 4)

    grid_spec = pltpu.PrefetchScalarGridSpec(
        num_scalar_prefetch=1,
        grid=(n_layers,),
        in_specs=[
            # input: constant block index -> fetched once, stays resident
            pl.BlockSpec((n_pad, d_in), lambda l, flags: (0, 0)),
            # weights: streamed layer-by-layer (double-buffered by the pipeline).
            # For very deep MLPs with tiny batches, pipeline_mode=pl.Buffered(3)
            # would hide more of the weight DMA; unnecessary at L=2.
            pl.BlockSpec((None, d_pad, d_pad), lambda l, flags: (l, 0, 0)),
            pl.BlockSpec((None, 8, d_pad), lambda l, flags: (l, 0, 0)),
        ],
        out_specs=pl.BlockSpec((n_pad, d_pad), lambda l, flags: (0, 0)),
        scratch_shapes=[pltpu.VMEM((n_pad, d_pad), jnp.bfloat16)],
    )

    out_pad = pl.pallas_call(
        functools.partial(_mlp_layer_kernel, n_real=n, d_in=d_in),
        out_shape=jax.ShapeDtypeStruct((n_pad, d_pad), jnp.float32),
        grid_spec=grid_spec,
        compiler_params=pltpu.CompilerParams(
            dimension_semantics=("arbitrary",),      # layer axis carries the activation
            vmem_limit_bytes=vmem_limit),
        cost_estimate=pl.CostEstimate(
            flops=flops,
            transcendentals=d_pad * n_layers,
            bytes_accessed=bytes_accessed),
    )(bn_flags, x, w_stack, v_stack)
    return out_pad[:n, :out_dim]


def _reference_forward_f32(x, params, layer_has_bn):
    """Pure-JAX f32 reference of the PyTorch forward (semantic check)."""
    h = x
    for p, has_bn in zip(params, layer_has_bn):
        h = jnp.dot(h, p["w"], precision=jax.lax.Precision.HIGHEST) + p["b"]
        if has_bn:
            mean = jnp.mean(h, axis=0, keepdims=True)
            var = jnp.mean((h - mean) ** 2, axis=0, keepdims=True)
            h = (h - mean) / jnp.sqrt(var + _EPS) * p["gamma"] + p["beta"]
            h = jnp.maximum(h, 0.0)
    return h


def _reference_forward_bf16(x, params, layer_has_bn):
    """Reference mirroring the kernel's precision (bf16 weights + bf16 carried
    activation, f32 accumulation and BN math) to isolate kernel-specific error."""
    h = x.astype(jnp.bfloat16)
    out = None
    for p, has_bn in zip(params, layer_has_bn):
        y = jnp.dot(h, p["w"].astype(jnp.bfloat16), preferred_element_type=jnp.float32)
        if has_bn:
            mean = jnp.mean(y, axis=0, keepdims=True)
            diff = y - mean
            var = jnp.mean(diff * diff, axis=0, keepdims=True)
            r = jnp.maximum(diff * jax.lax.rsqrt(var + _EPS) * p["gamma"] + p["beta"], 0.0)
        else:
            r = y + p["b"]
        h = r.astype(jnp.bfloat16)
        out = r
    return out


if __name__ == "__main__":
    hidden_sizes = [32, 64, 32]          # MLP([32, 64, 32], last_activation=True)
    last_activation = True
    batch = 8

    key = jax.random.PRNGKey(0)
    k_params, k_x = jax.random.split(key)
    params = init_mlp_params(k_params, hidden_sizes)
    x = jax.random.normal(k_x, (batch, hidden_sizes[0]), jnp.float32)

    n_layers = len(hidden_sizes) - 1
    layer_has_bn = tuple(
        (i < n_layers - 1) or last_activation for i in range(n_layers))
    bn_flags = jnp.asarray(layer_has_bn, dtype=jnp.int32)

    d_pad = _round_up(max(hidden_sizes), _LANE)
    w_stack, v_stack = pack_mlp_params(params, d_pad)

    out = mlp_forward(x, w_stack, v_stack, bn_flags, out_dim=hidden_sizes[-1])
    jax.block_until_ready(out)

    ref_bf16 = _reference_forward_bf16(x, params, layer_has_bn)
    ref_f32 = _reference_forward_f32(x, params, layer_has_bn)

    assert out.shape == (batch, hidden_sizes[-1])
    assert bool(jnp.all(jnp.isfinite(out)))
    assert bool(jnp.all(out >= 0.0))                 # ReLU after last layer
    err_matched = float(jnp.max(jnp.abs(out - ref_bf16)))
    assert bool(jnp.allclose(out, ref_bf16, rtol=2e-2, atol=2e-2)), err_matched
    err_f32 = float(jnp.max(jnp.abs(out - ref_f32)))
    assert bool(jnp.allclose(out, ref_f32, rtol=1e-1, atol=1e-1)), err_f32
    print("KERNEL_OK")
</pallas_src>

<mosaic_0001>
module attributes {stable_mosaic.version = 11 : i64} {
  func.func @_mlp_layer_kernel(%arg0: i32, %arg1: memref<2xi32, #tpu.memory_space<smem>>, %arg2: memref<8x32xf32, #tpu.memory_space<vmem>>, %arg3: memref<1x128x128xbf16, #tpu.memory_space<vmem>>, %arg4: memref<1x8x128xf32, #tpu.memory_space<vmem>>, %arg5: memref<8x128xf32, #tpu.memory_space<vmem>>, %arg6: memref<8x128xbf16, #tpu.memory_space<vmem>>) attributes {dimension_semantics = [#tpu.dimension_semantics<arbitrary>], iteration_bounds = array<i64: 2>, scalar_prefetch = 1 : i64, scratch_operands = 1 : i64, tpu.core_type = #tpu.core_type<tc>, window_params = [{pipeline_mode = #tpu.pipeline_mode<synchronous>, transform_indices = @transform_0, window_bounds = array<i64: 8, 32>}, {transform_indices = @transform_1, window_bounds = array<i64: 1, 128, 128>}, {transform_indices = @transform_2, window_bounds = array<i64: 1, 8, 128>}, {pipeline_mode = #tpu.pipeline_mode<synchronous>, transform_indices = @transform_3, window_bounds = array<i64: 8, 128>}]} {
    %c0_i32 = arith.constant 0 : i32
    %0 = arith.cmpi eq, %arg0, %c0_i32 : i32
    %1 = arith.extui %0 : i1 to i32
    %c0_i32_0 = arith.constant 0 : i32
    %2 = arith.cmpi ne, %1, %c0_i32_0 : i32
    scf.if %2 {
      %cst_16 = arith.constant 0.000000e+00 : bf16
      %22 = vector.broadcast %cst_16 : bf16 to vector<8x128xbf16>
      %c0_17 = arith.constant 0 : index
      %c0_18 = arith.constant 0 : index
      %23 = vector.load %arg6[%c0_17, %c0_18] : memref<8x128xbf16, #tpu.memory_space<vmem>>, vector<8x128xbf16>
      tpu.vector_store %arg6[%c0_17, %c0_18], %22 {strides = array<i32>} : memref<8x128xbf16, #tpu.memory_space<vmem>>, vector<8x128xbf16>,
      %c0_19 = arith.constant 0 : index
      %c0_20 = arith.constant 0 : index
      %24 = vector.load %arg2[%c0_19, %c0_20] : memref<8x32xf32, #tpu.memory_space<vmem>>, vector<8x32xf32>
      %25 = arith.truncf %24 : vector<8x32xf32> to vector<8x32xbf16>
      %c0_21 = arith.constant 0 : index
      %c0_22 = arith.constant 0 : index
      %26 = vector.load %arg6[%c0_21, %c0_22] : memref<8x128xbf16, #tpu.memory_space<vmem>>, vector<8x32xbf16>
      tpu.vector_store %arg6[%c0_21, %c0_22], %25 {strides = array<i32>} : memref<8x128xbf16, #tpu.memory_space<vmem>>, vector<8x32xbf16>,
    } else {
    }
    %c0 = arith.constant 0 : index
    %c0_1 = arith.constant 0 : index
    %3 = vector.load %arg6[%c0, %c0_1] : memref<8x128xbf16, #tpu.memory_space<vmem>>, vector<8x128xbf16>
    %c0_2 = arith.constant 0 : index
    %c0_3 = arith.constant 0 : index
    %c0_4 = arith.constant 0 : index
    %4 = vector.load %arg3[%c0_2, %c0_3, %c0_4] : memref<1x128x128xbf16, #tpu.memory_space<vmem>>, vector<1x128x128xbf16>
    %5 = vector.shape_cast %4 : vector<1x128x128xbf16> to vector<128x128xbf16>
    %cst = arith.constant dense<0.000000e+00> : vector<8x128xf32>
    %6 = tpu.matmul %3, %5, %cst {dimension_numbers = #tpu.dot_dimension_numbers<[1], [0], [0], [1], [0, 0, 1, 1], [], []>} : vector<8x128xbf16>, vector<128x128xbf16>, vector<8x128xf32> -> vector<8x128xf32>
    %c0_5 = arith.constant 0 : index
    %c0_6 = arith.constant 0 : index
    %c0_7 = arith.constant 0 : index
    %7 = vector.load %arg4[%c0_5, %c0_6, %c0_7] : memref<1x8x128xf32, #tpu.memory_space<vmem>>, vector<1x1x128xf32>
    %8 = vector.shape_cast %7 : vector<1x1x128xf32> to vector<1x128xf32>
    %c0_8 = arith.constant 0 : index
    %c1 = arith.constant 1 : index
    %c0_9 = arith.constant 0 : index
    %9 = vector.load %arg4[%c0_8, %c1, %c0_9] : memref<1x8x128xf32, #tpu.memory_space<vmem>>, vector<1x1x128xf32>
    %10 = vector.shape_cast %9 : vector<1x1x128xf32> to vector<1x128xf32>
    %c0_10 = arith.constant 0 : index
    %c2 = arith.constant 2 : index
    %c0_11 = arith.constant 0 : index
    %11 = vector.load %arg4[%c0_10, %c2, %c0_11] : memref<1x8x128xf32, #tpu.memory_space<vmem>>, vector<1x1x128xf32>
    %12 = vector.shape_cast %11 : vector<1x1x128xf32> to vector<1x128xf32>
    %13 = arith.index_cast %arg0 : i32 to index
    %14 = memref.load %arg1[%13] : memref<2xi32, #tpu.memory_space<smem>>
    %c0_i32_12 = arith.constant 0 : i32
    %15 = arith.cmpi ne, %14, %c0_i32_12 : i32
    %16 = arith.extui %15 : i1 to i32
    %cst_13 = arith.constant 1.250000e-01 : f32
    %c0_i32_14 = arith.constant 0 : i32
    %17 = arith.cmpi ne, %16, %c0_i32_14 : i32
    scf.if %17 {
      %cst_16 = arith.constant dense<0.000000e+00> : vector<128xf32>
      %22 = vector.multi_reduction <add>, %6, %cst_16 [0] : vector<8x128xf32> to vector<128xf32>
      %23 = vector.shape_cast %22 : vector<128xf32> to vector<1x128xf32>
      %24 = vector.broadcast %cst_13 : f32 to vector<1x128xf32>
      %25 = arith.mulf %23, %24 : vector<1x128xf32>
      %26 = vector.broadcast %25 : vector<1x128xf32> to vector<8x128xf32>
      %27 = arith.subf %6, %26 : vector<8x128xf32>
      %28 = arith.mulf %27, %27 : vector<8x128xf32>
      %cst_17 = arith.constant dense<0.000000e+00> : vector<128xf32>
      %29 = vector.multi_reduction <add>, %28, %cst_17 [0] : vector<8x128xf32> to vector<128xf32>
      %30 = vector.shape_cast %29 : vector<128xf32> to vector<1x128xf32>
      %31 = vector.broadcast %cst_13 : f32 to vector<1x128xf32>
      %32 = arith.mulf %30, %31 : vector<1x128xf32>
      %cst_18 = arith.constant 9.99999974E-6 : f32
      %33 = vector.broadcast %cst_18 : f32 to vector<1x128xf32>
      %34 = arith.addf %32, %33 : vector<1x128xf32>
      %35 = math.rsqrt %34 : vector<1x128xf32>
      %36 = vector.broadcast %35 : vector<1x128xf32> to vector<8x128xf32>
      %37 = arith.mulf %27, %36 : vector<8x128xf32>
      %38 = vector.broadcast %10 : vector<1x128xf32> to vector<8x128xf32>
      %39 = arith.mulf %37, %38 : vector<8x128xf32>
      %40 = vector.broadcast %12 : vector<1x128xf32> to vector<8x128xf32>
      %41 = arith.addf %39, %40 : vector<8x128xf32>
      %cst_19 = arith.constant 0.000000e+00 : f32
      %42 = vector.broadcast %cst_19 : f32 to vector<8x128xf32>
      %43 = arith.maximumf %41, %42 : vector<8x128xf32>
      %44 = arith.truncf %43 : vector<8x128xf32> to vector<8x128xbf16>
      %c0_20 = arith.constant 0 : index
      %c0_21 = arith.constant 0 : index
      %45 = vector.load %arg6[%c0_20, %c0_21] : memref<8x128xbf16, #tpu.memory_space<vmem>>, vector<8x128xbf16>
      tpu.vector_store %arg6[%c0_20, %c0_21], %44 {strides = array<i32>} : memref<8x128xbf16, #tpu.memory_space<vmem>>, vector<8x128xbf16>,
      %c0_22 = arith.constant 0 : index
      %c0_23 = arith.constant 0 : index
      %46 = vector.load %arg5[%c0_22, %c0_23] : memref<8x128xf32, #tpu.memory_space<vmem>>, vector<8x128xf32>
      tpu.vector_store %arg5[%c0_22, %c0_23], %43 {strides = array<i32>} : memref<8x128xf32, #tpu.memory_space<vmem>>, vector<8x128xf32>,
    } else {
    }
    %false = arith.constant false
    %18 = arith.xori %15, %false : i1
    %true = arith.constant true
    %19 = arith.xori %18, %true : i1
    %20 = arith.extui %19 : i1 to i32
    %c0_i32_15 = arith.constant 0 : i32
    %21 = arith.cmpi ne, %20, %c0_i32_15 : i32
    scf.if %21 {
      %22 = vector.broadcast %8 : vector<1x128xf32> to vector<8x128xf32>
      %23 = arith.addf %6, %22 : vector<8x128xf32>
      %24 = arith.truncf %23 : vector<8x128xf32> to vector<8x128xbf16>
      %c0_16 = arith.constant 0 : index
      %c0_17 = arith.constant 0 : index
      %25 = vector.load %arg6[%c0_16, %c0_17] : memref<8x128xbf16, #tpu.memory_space<vmem>>, vector<8x128xbf16>
      tpu.vector_store %arg6[%c0_16, %c0_17], %24 {strides = array<i32>} : memref<8x128xbf16, #tpu.memory_space<vmem>>, vector<8x128xbf16>,
      %c0_18 = arith.constant 0 : index
      %c0_19 = arith.constant 0 : index
      %26 = vector.load %arg5[%c0_18, %c0_19] : memref<8x128xf32, #tpu.memory_space<vmem>>, vector<8x128xf32>
      tpu.vector_store %arg5[%c0_18, %c0_19], %23 {strides = array<i32>} : memref<8x128xf32, #tpu.memory_space<vmem>>, vector<8x128xf32>,
    } else {
    }
    return
  }
  func.func @transform_0(%arg0: i32, %arg1: memref<2xi32, #tpu.memory_space<smem>>) -> (i32, i32) {
    %c0_i32 = arith.constant 0 : i32
    %c0_i32_0 = arith.constant 0 : i32
    %c0_i32_1 = arith.constant 0 : i32
    return %c0_i32, %c0_i32_0 : i32, i32
  }
  func.func @transform_1(%arg0: i32, %arg1: memref<2xi32, #tpu.memory_space<smem>>) -> (i32, i32, i32) {
    %c0_i32 = arith.constant 0 : i32
    %c0_i32_0 = arith.constant 0 : i32
    %c0_i32_1 = arith.constant 0 : i32
    return %arg0, %c0_i32, %c0_i32_0 : i32, i32, i32
  }
  func.func @transform_2(%arg0: i32, %arg1: memref<2xi32, #tpu.memory_space<smem>>) -> (i32, i32, i32) {
    %c0_i32 = arith.constant 0 : i32
    %c0_i32_0 = arith.constant 0 : i32
    %c0_i32_1 = arith.constant 0 : i32
    return %arg0, %c0_i32, %c0_i32_0 : i32, i32, i32
  }
  func.func @transform_3(%arg0: i32, %arg1: memref<2xi32, #tpu.memory_space<smem>>) -> (i32, i32) {
    %c0_i32 = arith.constant 0 : i32
    %c0_i32_0 = arith.constant 0 : i32
    %c0_i32_1 = arith.constant 0 : i32
    return %c0_i32, %c0_i32_0 : i32, i32
  }
}

</mosaic_0001>

<bundles_post_ra>
// kernel: mlp_forward.1
= control target key start
LH: loop header
LB: loop body
LE: loop exit
PB: predicated region body
PF: predicated region fallthrough
CT: control target
= control target key end

     0   :  { %s776_s18 = smov [#allocation4]   ;;  %s953_s0 = inlined_call_operand.vmem [shape: s32[2], index: 0, kind: input, shape index: {}]   ;;  %s954_s1 = inlined_call_operand.hbm [shape: f32[8,32], index: 1, kind: input, shape index: {}]   ;;  %s955_s2 = inlined_call_operand.hbm [shape: bf16[2,128,128], index: 2, kind: input, shape index: {}]   ;;  %s956_s3 = inlined_call_operand.hbm [shape: f32[2,8,128], index: 3, kind: input, shape index: {}]   ;;  %s957_s4 = inlined_call_operand.hbm [shape: f32[8,128], index: 4, kind: output, shape index: {}]  }
   0x1   :  { %s10_s17 = sshll.u32 %s953_s0, 4  ;;  %s11_s17 = int_to_ptr.vmem [resolvable:$true] %s10_s17 }
   0x2   :  { %13 = dma.vmem_to_smem %s11_s17, 16, %s776_s18, [#allocation3] }
   0x3   :  { %746 = dma.done.wait [#allocation3], 16 }
   0x4   :  { %747 = vsyncadd [#allocation3], 4294967280 }
   0x5   :  { %16 = sfence }
   0x6   :  { %17 = vsyncpa [#allocation6], 0 }
   0x7   :  { %18 = vsyncpa [#allocation9], 0 }
   0x8   :  { %20 = vsyncpa [#allocation9 + $0x1], 0 }
   0x9   :  { %21 = vsyncpa [#allocation7], 0  ;;  %s810_s19 = smov 0   ;;  %s812_s20 = smov 0  }
   0xa   :  { %s814_s21 = smov 0   ;;  %s816_s22 = smov 0  }
   0xb LB: > { %s831_s0 = sadd.s32 1, %s774_s22   ;;  %s55_s23 = sadd.s32 1, %s770_s21  ;;  %s774_s22 = sphi %s816_s22, %s964_s22   ;;  %s770_s21 = sphi %s814_s21, %s963_s21   ;;  %s766_s20 = sphi %s812_s20, %s962_s20   ;;  %s762_s19 = sphi %s810_s19, %s961_s19  }
   0xc   : > { %s52_s24 = ssub.s32 %s774_s22, %s831_s0  ;;  %p62_p0 = scmp.ne.s32.totalorder %s770_s21, %s766_s20 }
   0xd   : > { %p53_p1 = scmp.eq.s32.totalorder %s52_s24, 0  ;;  %p63_p2 = scmp.eq.s32.totalorder %s774_s22, 0 }
   0xe   : > { %p556_p3 = scmp.lt.s32.totalorder %s774_s22, 2  ;;  %s151_s26 = sand.u32 1, %s774_s22  }
   0xf   : > { %s841_s25 = scalar_select %p53_p1, %s770_s21, %s55_s23  }
  0x10   : > { %p64_p4 = por %p63_p2, %p62_p0  ;;  %s153_s27 = sand.u32 1, %s770_s21  }
  0x11   : > { %s475_s28 = sshll.u32 %s153_s27, 6  ;;  %s523_s29 = sshll.u32 %s774_s22, 6 }
  0x12   : > { %s160_s6 = scalar_lea.hbm %s955_s2, %s523_s29  ;;  %s155_s8 = scalar_lea.vmem [#allocation8], %s475_s28 }
  0x13   : > { %s161_s7 = sshll.u32 %s160_s6, 4  ;;  %s163_s9 = sshll.u32 %s155_s8, 4  ;;  %s162_s7 = int_to_ptr.hbm [resolvable:$true] %s161_s7  ;;  %s164_s9 = int_to_ptr.vmem [resolvable:$true] %s163_s9 }
  0x14   : > { %p853_p5 = pnand %p556_p3, %p64_p4  ;;  %s857_s11 = scalar_lea.sflag [#allocation9], %s151_s26 }
  0x15   : > { %s612_s12 = sshra.s32 %s162_s7, 4  ;;  %s619_s16 = scalar_lea.hbm %s955_s2, 128  ;;  %s613_s12 = int_to_ptr.hbm [resolvable:$true] %s612_s12 }
  0x16   : > { %s614_s13 = scalar_lea.hbm %s613_s12, 64  ;;  %p616_p7 = pneg %p853_p5 }
  0x17   : > { %p615_p6 = scmp.ne.s32.totalorder %s613_s12, %s614_s13  ;;  %p620_p10 = scmp.lt.s32.totalorder %s613_s12, %s955_s2 }
  0x18   : > { %p621_p11 = scmp.lt.s32.totalorder %s619_s16, %s614_s13 }
  0x19   : > { %p617_p8 = pnand %p616_p7, %p615_p6 }
  0x1a   : > { %p622_p12 = por %p621_p11, %p620_p10 }
  0x1b   : > { %p618_p9 = pneg %p617_p8 }
  0x1d   : > { %p623_p13 = pnand %p622_p12, %p618_p9 }
  0x1f   : > { %626 = shalt.err (!%p623_p13)
}
  0x20   : > { %s777_s23 = smov 64   ;;  %s778_s24 = smov 4  }
  0x21   : > { %551 = dma.hbm_to_vmem [thread:$0]  (!%p853_p5), %s162_s7, 1024, %s164_s9, %s857_s11, %s777_s23, %s777_s23, %s778_s24  }
  0x22   : > { %s874_s26 = sadd.s32 4294967295, %s774_s22   ;;  %p68_p0 = scmp.ne.s32.totalorder %s766_s20, %s762_s19 }
  0x23   : > { %p69_p1 = scmp.eq.s32.totalorder %s874_s26, 0  ;;  %p472_p2 = scmp.ge.s32.totalorder %s774_s22, 1 }
  0x24   : > { %p126_p3 = scmp.lt.s32.totalorder %s774_s22, 3  ;;  %p473_p4 = scmp.ne.s32.totalorder %s874_s26, 0 }
  0x25   : > { %p884_p6 = por %p69_p1, %p68_p0  ;;  %s138_s5 = sshll.u32 %s954_s1, 4  ;;  %s139_s5 = int_to_ptr.hbm [resolvable:$true] %s138_s5 }
  0x26   : > { %p891_p8 = pnand %p472_p2, %p126_p3  ;;  %s478_s19 = sshll.u32 %s153_s27, 3 }
  0x27   : > { %s779_s7 = smov [#allocation5]   ;;  %s479_s9 = sshll.u32 %s774_s22, 3 }
  0x28   : > { %p544_p9 = pneg %p891_p8  ;;  %s140_s8 = sshll.u32 %s779_s7, 4  ;;  %s141_s8 = int_to_ptr.vmem [resolvable:$true] %s140_s8 }
  0x29   : > { %s181_s14 = scalar_lea.hbm %s956_s3, %s479_s9  ;;  %s177_s15 = scalar_lea.vmem [#allocation10], %s478_s19 }
  0x2a   : > { %p545_p10 = pnand %p544_p9, %p69_p1  ;;  %s185_s16 = sshll.u32 %s177_s15, 4  ;;  %s186_s16 = int_to_ptr.vmem [resolvable:$true] %s185_s16 }
  0x2b   : > { %s183_s17 = sshll.u32 %s181_s14, 4  ;;  %s679_s24 = scalar_lea.hbm %s956_s3, 16  ;;  %s184_s17 = int_to_ptr.hbm [resolvable:$true] %s183_s17 }
  0x2c   : > { %547 = dma.hbm_to_vmem [thread:$0]  (!%p545_p10), %s139_s5, 128, %s141_s8, [#allocation6]  }
  0x2d   : > { %s672_s27 = sshra.s32 %s184_s17, 4  ;;  %s673_s27 = int_to_ptr.hbm [resolvable:$true] %s672_s27 }
  0x2e   : > { %s674_s18 = scalar_lea.hbm %s673_s27, 8  ;;  %p680_p0 = scmp.lt.s32.totalorder %s673_s27, %s956_s3 }
  0x2f   : > { %p675_p11 = scmp.ne.s32.totalorder %s673_s27, %s674_s18  ;;  %p681_p2 = scmp.lt.s32.totalorder %s679_s24, %s674_s18 }
  0x31   : > { %p677_p12 = pnand %p675_p11, %p616_p7  ;;  %p682_p3 = por %p681_p2, %p680_p0 }
  0x33   : > { %p678_p13 = pneg %p677_p12 }
  0x35   : > { %p683_p9 = pnand %p682_p3, %p678_p13 }
  0x37   : > { %686 = shalt.err (!%p683_p9)
}
  0x38   : > { %554 = dma.hbm_to_vmem [thread:$0]  (!%p853_p5), %s184_s17, 128, %s186_s16, %s857_s11  }
  0x39   : > { %194 = sbr.rel (%p891_p8) target bundleno = 325 (0x145), region = 32 }
  0x3e   : > { %749 = dma.done.wait (%p69_p1), [#allocation6], 128  }
  0x3f   : > { %751 = vsyncadd (%p69_p1), [#allocation6], 4294967168  ;;  %s201_s5 = sand.u32 1, %s874_s26   ;;  %s203_s19 = sand.u32 1, %s766_s20  }
  0x40   : > { %s482_s7 = sshll.u32 %s203_s19, 6  ;;  %s202_s8 = scalar_lea.sflag [#allocation9], %s201_s5 }
  0x41   : > { %s205_s9 = scalar_lea.vmem [#allocation8], %s482_s7 }
  0x42   : > { %753 = dma.done.wait (%p884_p6), %s202_s8, 1152  }
  0x43   : > { %755 = vsyncadd (%p884_p6), %s202_s8, 4294966144  ;;  %s483_s10 = sshll.u32 %s203_s19, 3  ;;  %243 = sbr.rel (%p473_p4) target bundleno = 76 (0x4c), region = 48 }
  0x44   : > { %s215_s11 = scalar_lea.vmem [#allocation10], %s483_s10 }
  0x48   : > { %v245_v0 = vld [vmem:[#allocation5] sm:$0xff]  ;;  %vm247_vm0 = vcmask 257024   ;;  %v780_v1 = vmov 0  }
  0x49   : > { %244 = vst [vmem:[#allocation2] sm:$0xf] %v780_v1  ;;  %v246_v2 = vpack.c.bf16 %v245_v0, %v245_v0 }
  0x4b   : > { %248 = vst.msk [vmem:[#allocation2] sm:$0xf] %vm247_vm0, %v246_v2 }
  0x4c PF: > { %v531_v3 = vld [vmem:[%s205_s9 + $0x38] sm:$0xff]  ;;  %v530_v4 = vld [vmem:[%s205_s9 + $0x30] sm:$0xff]  ;;  %v529_v5 = vld [vmem:[%s205_s9 + $0x28] sm:$0xff]  ;;  %s932_s28 = sld [smem:[#allocation4 + %s874_s26]] }
  0x4d   : > { %314 = vmatpush.bf16.msra.mxu0 %v531_v3  ;;  %v528_v6 = vld [vmem:[%s205_s9 + $0x20] sm:$0xff]  ;;  %v527_v7 = vld [vmem:[%s205_s9 + $0x18] sm:$0xff]  ;;  %v526_v8 = vld [vmem:[%s205_s9 + $0x10] sm:$0xff] }
  0x4e   : > { %v525_v9 = vld [vmem:[%s205_s9 + $0x8] sm:$0xff]  ;;  %v524_v10 = vld [vmem:[%s205_s9] sm:$0xff] }
  0x4f   : > { %v327_v12 = vld [vmem:[%s215_s11] sm:$0x1]  ;;  %v328_v13 = vld [vmem:[%s215_s11 + $0x1] sm:$0x1]  ;;  %v329_v14 = vld [vmem:[%s215_s11 + $0x2] sm:$0x1] }
  0x51   : > { %315 = vmatpush.bf16.msra.mxu0 %v530_v4 }
  0x52   : > { %v249_v11 = vld [vmem:[#allocation2] sm:$0xf]  ;;  %p517_p5 = scmp.eq.s32.totalorder %s932_s28, 0 }
  0x55   : > { %316 = vmatpush.bf16.msra.mxu0 %v529_v5 }
  0x59   : > { %317 = vmatpush.bf16.msra.mxu0 %v528_v6 }
  0x5d   : > { %318 = vmatpush.bf16.msra.mxu0 %v527_v7 }
  0x61   : > { %319 = vmatpush.bf16.msra.mxu0 %v526_v8 }
  0x65   : > { %320 = vmatpush.bf16.msra.mxu0 %v525_v9 }
  0x69   : > { %321 = vmatpush.bf16.msra.mxu0 %v524_v10 }
  0x6c   : > { %322 = vmatmul.bf16.vlgmr.msra.gmra.mxu0 %v249_v11 }
  0xe9   : > { %v323_v15 = vpop.f32.mrf.mxu0 }
  0xed   : > { %334 = sbr.rel (%p517_p5) target bundleno = 305 (0x131), region = 52 }
  0xf1   : > { %v325_v16 = vpop.f32.mrf.mxu0 }
  0xf2   : > { %v335_v17 = vrot.slane %v323_v15, 4  ;;  %v363_v40 = vperm.slane %v328_v13, 0  ;;  %v365_v43 = vperm.slane %v329_v14, 0 }
  0xf4   : > { %v336_v18 = vadd.f32 %v335_v17, %v323_v15 }
  0xf6   : > { %v337_v19 = vrot.slane %v336_v18, 2 }
  0xf8   : > { %v338_v20 = vadd.f32 %v337_v19, %v336_v18 }
  0xfa   : > { %v339_v21 = vrot.slane %v338_v20, 1 }
  0xfc   : > { %v340_v22 = vadd.f32 %v339_v21, %v338_v20 }
  0xfe   : > { %v341_v23 = vmul.f32 0.125, %v340_v22 }
 0x100   : > { %v342_v24 = vsub.f32 %v323_v15, %v341_v23 }
 0x102   : > { %v343_v25 = vmul.f32 %v342_v24, %v342_v24 }
 0x104   : > { %v344_v26 = vrot.slane %v343_v25, 4 }
 0x106   : > { %v345_v27 = vadd.f32 %v344_v26, %v343_v25 }
 0x108   : > { %v346_v28 = vrot.slane %v345_v27, 2 }
 0x10a   : > { %v347_v29 = vadd.f32 %v346_v28, %v345_v27 }
 0x10c   : > { %v348_v30 = vrot.slane %v347_v29, 1 }
 0x10e   : > { %v349_v31 = vadd.f32 %v348_v30, %v347_v29 }
 0x110   : > { %v350_v32 = vmul.f32 0.125, %v349_v31 }
 0x112   : > { %v351_v33 = vadd.f32 1e-05, %v350_v32 }
 0x114   : > { %598 = vrsqrt.f32 %v351_v33  ;;  %vm358_vm1 = vweird.f32 %v351_v33 }
 0x11a   : > { %v599_v34 = vpop.eup %598 }
 0x11b   : > { %v353_v35 = vmul.f32 %v599_v34, %v351_v33  ;;  %vm359_vm2 = vweird.f32 %v599_v34 }
 0x11c   : > { %vm360_vm3 = vmor %vm358_vm1, %vm359_vm2 }
 0x11d   : > { %v354_v36 = vmul.f32 %v599_v34, %v353_v35 }
 0x11f   : > { %v355_v37 = vmul.f32 0.5, %v354_v36 }
 0x121   : > { %v356_v38 = vsub.f32 1.5, %v355_v37 }
 0x123   : > { %v357_v39 = vmul.f32 %v599_v34, %v356_v38 }
 0x125   : > { %v361_v41 = vsel %vm360_vm3, %v599_v34, %v357_v39 }
 0x126   : > { %v362_v42 = vmul.f32 %v361_v41, %v342_v24 }
 0x128   : > { %v364_v44 = vmul.f32 %v363_v40, %v362_v42 }
 0x12a   : > { %v366_v45 = vadd.f32 %v365_v43, %v364_v44 }
 0x12c   : > { %v367_v46 = vmax.f32 %v366_v45, 0.0 }
 0x12e   : > { %v368_v47 = vpack.c.bf16 %v367_v46, %v367_v46  ;;  %370 = vst [vmem:[#allocation11] sm:$0xff] %v367_v46 }
 0x130   : > { %369 = vst [vmem:[#allocation2] sm:$0xf] %v368_v47 }
 0x131 PF: > { %p518_p7 = scmp.ne.s32.totalorder %s932_s28, 0 }
 0x133   : > { %374 = sbr.rel (%p518_p7) target bundleno = 319 (0x13f), region = 56 }
 0x138   : > { %v375_v48 = vperm.slane %v327_v12, 0 }
 0x13a   : > { %v376_v49 = vadd.f32 %v375_v48, %v323_v15 }
 0x13c   : > { %v377_v50 = vpack.c.bf16 %v376_v49, %v376_v49  ;;  %379 = vst [vmem:[#allocation11] sm:$0xff] %v376_v49 }
 0x13e   : > { %378 = vst [vmem:[#allocation2] sm:$0xf] %v377_v50 }
 0x13f PF: > { %p558_p1 = scmp.eq.s32.totalorder %s874_s26, 1  ;;  %s388_s13 = sshll.u32 %s957_s4, 4  ;;  %s389_s13 = int_to_ptr.hbm [resolvable:$true] %s388_s13 }
 0x140   : > { %s781_s14 = smov [#allocation11]  }
 0x141   : > { %s386_s15 = sshll.u32 %s781_s14, 4  ;;  %s387_s15 = int_to_ptr.vmem [resolvable:$true] %s386_s15 }
 0x142   : > { %541 = dma.vmem_to_hbm [thread:$0]  (%p558_p1), %s387_s15, 128, %s389_s13, [#allocation7]  }
 0x143   : > { %757 = dma.done.wait (%p558_p1), [#allocation7], 128  }
 0x144   : > { %759 = vsyncadd (%p558_p1), [#allocation7], 4294967168 }
 0x145 PF: > { %p24_p4 = scmp.ge.s32.totalorder %s831_s0, 4   ;;  %s961_s19 = smov %s766_s20 }
 0x146   : > { %s962_s20 = smov %s770_s21  ;;  %s963_s21 = smov %s841_s25 }
 0x147   : > { %s964_s22 = smov %s831_s0  ;;  %26 = sbr.rel (!%p24_p4) target bundleno = 11 (0xb), region = 97 }
 0x14c   :  { %402 = vsyncpa [#allocation6], 1 }
 0x14d   :  { %404 = vsyncpa [#allocation6 + $0x1], 1 }
 0x14e   :  { %405 = vsyncpa [#allocation9], 1 }
 0x14f   :  { %407 = vsyncpa [#allocation9 + $0x1], 1 }
 0x150   :  { %408 = vsyncpa [#allocation7], 1 }
 0x151   :  { %410 = vsyncpa [#allocation7 + $0x1], 1 }

</bundles_post_ra>
